<compile_context>
chip_gen: v6e
topology: v6e:2x2x1
jax: 0.10.0
libtpu: 0.0.40
codegen_flags: <defaults>
</compile_context>

<pallas_src>
import functools
import math

import jax
import jax.numpy as jnp
from jax import lax
from jax.experimental import pallas as pl
from jax.experimental.pallas import tpu as pltpu


# ---------------------------------------------------------------------------
# helpers
# ---------------------------------------------------------------------------

def _vmem_limit_bytes() -> int:
    """Per-generation scoped-VMEM budget, with headroom for double buffering."""
    cap = None
    try:
        cap = getattr(pltpu.get_tpu_info(), "vmem_capacity_bytes", None)
    except Exception:
        cap = None
    if not cap:
        cap = 128 * 1024 * 1024            # v5e / v6e physical VMEM
    return int(min(cap * 3 // 4, 100 * 1024 * 1024))


def _sublane(dtype) -> int:
    """Sublane packing multiple for a dtype (f32: 8, bf16: 16, int8/fp8: 32)."""
    return {4: 8, 2: 16, 1: 32}.get(jnp.dtype(dtype).itemsize, 8)


def _pick_tile(total: int, target: int, mult: int) -> int:
    """Largest tile <= target that divides `total` and is a multiple of `mult`.
    Falls back to the full extent (always a legal block shape)."""
    if total <= target:
        return total
    t = (target // mult) * mult
    while t >= mult:
        if total % t == 0:
            return t
        t -= mult
    return total


def _pick_batch_block(B: int, S: int, E: int, itemsize: int) -> int:
    """Batch rows per grid step: ~1 MiB of x per step, bounded by the f32 acc."""
    per_row = max(S * E * itemsize, 1)
    bt = max(1, min(B, (1 << 20) // per_row))
    while bt > 1 and bt * S * E * 4 > (8 << 20):   # cap (Bt, S, E) f32 accumulator
        bt -= 1
    while B % bt != 0:                              # even blocks: simple & safe
        bt -= 1
    return bt


# ---------------------------------------------------------------------------
# kernels
# ---------------------------------------------------------------------------

def _flash_keyaxis_kernel(q_ref, kv_ref, o_ref, m_ref, l_ref, acc_ref, *, scale):
    """Online-softmax self-attention, softmax over the KEY axis (2-D input)."""
    ki = pl.program_id(1)

    @pl.when(ki == 0)
    def _():
        m_ref[...] = jnp.full_like(m_ref, -jnp.inf)
        l_ref[...] = jnp.zeros_like(l_ref)
        acc_ref[...] = jnp.zeros_like(acc_ref)

    q = q_ref[...] * scale                  # fold 1/sqrt(E) into q (tq*E muls)
    kv = kv_ref[...]

    # s[i, j] = q[i, :] . kv[j, :]  -> (tq, tk), f32 accumulation on the MXU.
    s = lax.dot_general(q, kv, (((1,), (1,)), ((), ())),
                        preferred_element_type=jnp.float32)

    m_prev = m_ref[...]
    m_new = jnp.maximum(m_prev, jnp.max(s, axis=1, keepdims=True))
    alpha = jnp.exp(m_prev - m_new)
    p = jnp.exp(s - m_new)                  # single (tq, tk)-sized EUP pass
    l_ref[...] = alpha * l_ref[...] + jnp.sum(p, axis=1, keepdims=True)
    acc_ref[...] = alpha * acc_ref[...] + jnp.dot(
        p.astype(kv.dtype), kv, preferred_element_type=jnp.float32)
    m_ref[...] = m_new

    @pl.when(ki == pl.num_programs(1) - 1)
    def _():
        # Normalization deferred to the very end: one (tq, E) multiply.
        o_ref[...] = (acc_ref[...] * pl.reciprocal(l_ref[...])).astype(o_ref.dtype)


def _queryaxis_kernel(xq_ref, xkv_ref, o_ref, acc_ref, *, scale, bt):
    """Self-attention with softmax over the QUERY axis (torch dim=1, 3-D input).

    Per-key-column stats are complete within a kv tile (the full query axis is
    resident), so kv tiling needs no online renormalization.
    """
    ki = pl.program_id(1)

    @pl.when(ki == 0)
    def _():
        acc_ref[...] = jnp.zeros_like(acc_ref)

    for b in range(bt):                     # static unroll over the batch block
        q = xq_ref[b] * scale               # (S, E)
        kv = xkv_ref[b]                     # (tk, E)
        s = lax.dot_general(q, kv, (((1,), (1,)), ((), ())),
                            preferred_element_type=jnp.float32)       # (S, tk)
        m = jnp.max(s, axis=0, keepdims=True)                          # (1, tk)
        p = jnp.exp(s - m)                                             # (S, tk)
        inv = pl.reciprocal(jnp.sum(p, axis=0, keepdims=True))         # (1, tk)
        # Fold 1/colsum into the value rows (tk*E muls) instead of scaling the
        # (S, tk) probability tile; only a tiny (1, tk) lane->sublane relayout.
        kv_scaled = (kv * jnp.transpose(inv)).astype(kv.dtype)         # (tk, E)
        acc_ref[b] = acc_ref[b] + jnp.dot(
            p.astype(kv.dtype), kv_scaled, preferred_element_type=jnp.float32)

    @pl.when(ki == pl.num_programs(1) - 1)
    def _():
        o_ref[...] = acc_ref[...].astype(o_ref.dtype)


# ---------------------------------------------------------------------------
# wrappers
# ---------------------------------------------------------------------------

def _self_attention_2d(x):
    S, E = x.shape
    scale = 1.0 / math.sqrt(E)
    sub = _sublane(x.dtype)
    tq = _pick_tile(S, 256, sub)
    tk = _pick_tile(S, 512, sub)
    n_kv = S // tk

    kv_map = lambda qi, ki: (ki, 0)
    if n_kv >= 4:
        # kv DMA can be exposed when per-tile compute is small (small E).
        kv_spec = pl.BlockSpec((tk, E), kv_map, pipeline_mode=pl.Buffered(3))
    else:
        kv_spec = pl.BlockSpec((tk, E), kv_map)

    kernel = functools.partial(_flash_keyaxis_kernel, scale=scale)
    return pl.pallas_call(
        kernel,
        grid=(S // tq, n_kv),
        in_specs=[pl.BlockSpec((tq, E), lambda qi, ki: (qi, 0)), kv_spec],
        out_specs=pl.BlockSpec((tq, E), lambda qi, ki: (qi, 0)),
        out_shape=jax.ShapeDtypeStruct((S, E), x.dtype),
        scratch_shapes=[pltpu.VMEM((tq, 1), jnp.float32),
                        pltpu.VMEM((tq, 1), jnp.float32),
                        pltpu.VMEM((tq, E), jnp.float32)],
        compiler_params=pltpu.CompilerParams(
            dimension_semantics=("parallel", "arbitrary"),
            vmem_limit_bytes=_vmem_limit_bytes()),
    )(x, x)


def _self_attention_3d(x):
    B, S, E = x.shape
    scale = 1.0 / math.sqrt(E)
    sub = _sublane(x.dtype)
    bt = _pick_batch_block(B, S, E, jnp.dtype(x.dtype).itemsize)
    tk = _pick_tile(S, 512, sub)
    n_kv = S // tk

    kv_map = lambda b, k: (b, k, 0)
    if n_kv >= 4:
        kv_spec = pl.BlockSpec((bt, tk, E), kv_map, pipeline_mode=pl.Buffered(3))
    else:
        kv_spec = pl.BlockSpec((bt, tk, E), kv_map)

    kernel = functools.partial(_queryaxis_kernel, scale=scale, bt=bt)
    return pl.pallas_call(
        kernel,
        grid=(B // bt, n_kv),
        in_specs=[pl.BlockSpec((bt, S, E), lambda b, k: (b, 0, 0)), kv_spec],
        out_specs=pl.BlockSpec((bt, S, E), lambda b, k: (b, 0, 0)),
        out_shape=jax.ShapeDtypeStruct((B, S, E), x.dtype),
        scratch_shapes=[pltpu.VMEM((bt, S, E), jnp.float32)],
        compiler_params=pltpu.CompilerParams(
            dimension_semantics=("parallel", "arbitrary"),
            vmem_limit_bytes=_vmem_limit_bytes()),
    )(x, x)


@jax.jit
def dot_product_self_attention(inputs):
    """Forward pass of the PyTorch DotProductSelfAttention module."""
    if inputs.ndim == 2:
        return _self_attention_2d(inputs)
    if inputs.ndim == 3:
        return _self_attention_3d(inputs)
    raise ValueError(f"expected 2-D or 3-D input, got shape {inputs.shape}")


def _reference(inputs):
    """Pure-JAX transcription of the PyTorch module (softmax over dim=1)."""
    E = inputs.shape[-1]
    scores = jnp.matmul(inputs, jnp.swapaxes(inputs, -2, -1)) / math.sqrt(E)
    weights = jax.nn.softmax(scores, axis=1)
    return jnp.matmul(weights, inputs)


if __name__ == "__main__":
    rng = jax.random.PRNGKey(0)
    k3d, k2d = jax.random.split(rng, 2)

    # 3-D batched self-attention input: batch=2, seq=8, hidden=32.
    x3 = jax.random.normal(k3d, (2, 8, 32), dtype=jnp.float32)
    out3 = jax.block_until_ready(dot_product_self_attention(x3))
    ref3 = _reference(x3)
    assert out3.shape == x3.shape, out3.shape
    assert jnp.allclose(out3, ref3, atol=1e-5, rtol=1e-5), \
        f"3-D max err {jnp.max(jnp.abs(out3 - ref3))}"

    # 2-D input path (key-axis softmax under torch's dim=1), flash-style kernel.
    x2 = jax.random.normal(k2d, (8, 32), dtype=jnp.float32)
    out2 = jax.block_until_ready(dot_product_self_attention(x2))
    ref2 = _reference(x2)
    assert out2.shape == x2.shape, out2.shape
    assert jnp.allclose(out2, ref2, atol=1e-5, rtol=1e-5), \
        f"2-D max err {jnp.max(jnp.abs(out2 - ref2))}"

    print("KERNEL_OK")
</pallas_src>

<mosaic_0001>
module attributes {stable_mosaic.version = 11 : i64} {
  func.func @_queryaxis_kernel(%arg0: i32, %arg1: i32, %arg2: memref<2x8x32xf32, #tpu.memory_space<vmem>>, %arg3: memref<2x8x32xf32, #tpu.memory_space<vmem>>, %arg4: memref<2x8x32xf32, #tpu.memory_space<vmem>>, %arg5: memref<2x8x32xf32, #tpu.memory_space<vmem>>) attributes {dimension_semantics = [#tpu.dimension_semantics<parallel>, #tpu.dimension_semantics<arbitrary>], iteration_bounds = array<i64: 1, 1>, scalar_prefetch = 0 : i64, scratch_operands = 1 : i64, tpu.core_type = #tpu.core_type<tc>, window_params = [{transform_indices = @transform_0, window_bounds = array<i64: 2, 8, 32>}, {transform_indices = @transform_1, window_bounds = array<i64: 2, 8, 32>}, {transform_indices = @transform_2, window_bounds = array<i64: 2, 8, 32>}]} {
    %c0_i32 = arith.constant 0 : i32
    %0 = arith.cmpi eq, %arg1, %c0_i32 : i32
    %1 = arith.extui %0 : i1 to i32
    %c0_i32_0 = arith.constant 0 : i32
    %2 = arith.cmpi ne, %1, %c0_i32_0 : i32
    scf.if %2 {
      %cst_34 = arith.constant 0.000000e+00 : f32
      %56 = vector.broadcast %cst_34 : f32 to vector<2x8x32xf32>
      %c0_35 = arith.constant 0 : index
      %c0_36 = arith.constant 0 : index
      %c0_37 = arith.constant 0 : index
      %57 = vector.load %arg5[%c0_35, %c0_36, %c0_37] : memref<2x8x32xf32, #tpu.memory_space<vmem>>, vector<2x8x32xf32>
      tpu.vector_store %arg5[%c0_35, %c0_36, %c0_37], %56 {strides = array<i32>} : memref<2x8x32xf32, #tpu.memory_space<vmem>>, vector<2x8x32xf32>,
    } else {
    }
    %c0 = arith.constant 0 : index
    %c0_1 = arith.constant 0 : index
    %c0_2 = arith.constant 0 : index
    %3 = vector.load %arg2[%c0, %c0_1, %c0_2] : memref<2x8x32xf32, #tpu.memory_space<vmem>>, vector<1x8x32xf32>
    %4 = vector.shape_cast %3 : vector<1x8x32xf32> to vector<8x32xf32>
    %cst = arith.constant 0.176776692 : f32
    %5 = vector.broadcast %cst : f32 to vector<8x32xf32>
    %6 = arith.mulf %4, %5 : vector<8x32xf32>
    %c0_3 = arith.constant 0 : index
    %c0_4 = arith.constant 0 : index
    %c0_5 = arith.constant 0 : index
    %7 = vector.load %arg3[%c0_3, %c0_4, %c0_5] : memref<2x8x32xf32, #tpu.memory_space<vmem>>, vector<1x8x32xf32>
    %8 = vector.shape_cast %7 : vector<1x8x32xf32> to vector<8x32xf32>
    %cst_6 = arith.constant dense<0.000000e+00> : vector<8x8xf32>
    %9 = tpu.matmul %6, %8, %cst_6 {dimension_numbers = #tpu.dot_dimension_numbers<[1], [1], [0], [0], [0, 0, 1, 0], [], []>} : vector<8x32xf32>, vector<8x32xf32>, vector<8x8xf32> -> vector<8x8xf32>
    %cst_7 = arith.constant dense<0xFF800000> : vector<8xf32>
    %10 = vector.multi_reduction <maximumf>, %9, %cst_7 [0] : vector<8x8xf32> to vector<8xf32>
    %11 = vector.shape_cast %10 : vector<8xf32> to vector<1x8xf32>
    %12 = vector.broadcast %11 : vector<1x8xf32> to vector<8x8xf32>
    %13 = arith.subf %9, %12 : vector<8x8xf32>
    %14 = math.exp %13 : vector<8x8xf32>
    %cst_8 = arith.constant dense<0.000000e+00> : vector<8xf32>
    %15 = vector.multi_reduction <add>, %14, %cst_8 [0] : vector<8x8xf32> to vector<8xf32>
    %16 = vector.shape_cast %15 : vector<8xf32> to vector<1x8xf32>
    %17 = tpu.reciprocal %16 : vector<1x8xf32> -> vector<1x8xf32>
    %18 = tpu.transpose %17, [1, 0] : vector<1x8xf32> -> vector<8x1xf32>
    %19 = vector.broadcast %18 : vector<8x1xf32> to vector<8x32xf32>
    %20 = arith.mulf %8, %19 : vector<8x32xf32>
    %c0_9 = arith.constant 0 : index
    %c0_10 = arith.constant 0 : index
    %c0_11 = arith.constant 0 : index
    %21 = vector.load %arg5[%c0_9, %c0_10, %c0_11] : memref<2x8x32xf32, #tpu.memory_space<vmem>>, vector<1x8x32xf32>
    %22 = vector.shape_cast %21 : vector<1x8x32xf32> to vector<8x32xf32>
    %cst_12 = arith.constant dense<0.000000e+00> : vector<8x32xf32>
    %23 = tpu.matmul %14, %20, %cst_12 {dimension_numbers = #tpu.dot_dimension_numbers<[1], [0], [0], [1], [0, 0, 1, 1], [], []>} : vector<8x8xf32>, vector<8x32xf32>, vector<8x32xf32> -> vector<8x32xf32>
    %24 = arith.addf %22, %23 : vector<8x32xf32>
    %c0_13 = arith.constant 0 : index
    %c0_14 = arith.constant 0 : index
    %c0_15 = arith.constant 0 : index
    %25 = vector.load %arg5[%c0_13, %c0_14, %c0_15] : memref<2x8x32xf32, #tpu.memory_space<vmem>>, vector<1x8x32xf32>
    %26 = vector.shape_cast %25 : vector<1x8x32xf32> to vector<8x32xf32>
    %27 = vector.shape_cast %24 : vector<8x32xf32> to vector<1x8x32xf32>
    tpu.vector_store %arg5[%c0_13, %c0_14, %c0_15], %27 {strides = array<i32>} : memref<2x8x32xf32, #tpu.memory_space<vmem>>, vector<1x8x32xf32>,
    %c1 = arith.constant 1 : index
    %c0_16 = arith.constant 0 : index
    %c0_17 = arith.constant 0 : index
    %28 = vector.load %arg2[%c1, %c0_16, %c0_17] : memref<2x8x32xf32, #tpu.memory_space<vmem>>, vector<1x8x32xf32>
    %29 = vector.shape_cast %28 : vector<1x8x32xf32> to vector<8x32xf32>
    %cst_18 = arith.constant 0.176776692 : f32
    %30 = vector.broadcast %cst_18 : f32 to vector<8x32xf32>
    %31 = arith.mulf %29, %30 : vector<8x32xf32>
    %c1_19 = arith.constant 1 : index
    %c0_20 = arith.constant 0 : index
    %c0_21 = arith.constant 0 : index
    %32 = vector.load %arg3[%c1_19, %c0_20, %c0_21] : memref<2x8x32xf32, #tpu.memory_space<vmem>>, vector<1x8x32xf32>
    %33 = vector.shape_cast %32 : vector<1x8x32xf32> to vector<8x32xf32>
    %cst_22 = arith.constant dense<0.000000e+00> : vector<8x8xf32>
    %34 = tpu.matmul %31, %33, %cst_22 {dimension_numbers = #tpu.dot_dimension_numbers<[1], [1], [0], [0], [0, 0, 1, 0], [], []>} : vector<8x32xf32>, vector<8x32xf32>, vector<8x8xf32> -> vector<8x8xf32>
    %cst_23 = arith.constant dense<0xFF800000> : vector<8xf32>
    %35 = vector.multi_reduction <maximumf>, %34, %cst_23 [0] : vector<8x8xf32> to vector<8xf32>
    %36 = vector.shape_cast %35 : vector<8xf32> to vector<1x8xf32>
    %37 = vector.broadcast %36 : vector<1x8xf32> to vector<8x8xf32>
    %38 = arith.subf %34, %37 : vector<8x8xf32>
    %39 = math.exp %38 : vector<8x8xf32>
    %cst_24 = arith.constant dense<0.000000e+00> : vector<8xf32>
    %40 = vector.multi_reduction <add>, %39, %cst_24 [0] : vector<8x8xf32> to vector<8xf32>
    %41 = vector.shape_cast %40 : vector<8xf32> to vector<1x8xf32>
    %42 = tpu.reciprocal %41 : vector<1x8xf32> -> vector<1x8xf32>
    %43 = tpu.transpose %42, [1, 0] : vector<1x8xf32> -> vector<8x1xf32>
    %44 = vector.broadcast %43 : vector<8x1xf32> to vector<8x32xf32>
    %45 = arith.mulf %33, %44 : vector<8x32xf32>
    %c1_25 = arith.constant 1 : index
    %c0_26 = arith.constant 0 : index
    %c0_27 = arith.constant 0 : index
    %46 = vector.load %arg5[%c1_25, %c0_26, %c0_27] : memref<2x8x32xf32, #tpu.memory_space<vmem>>, vector<1x8x32xf32>
    %47 = vector.shape_cast %46 : vector<1x8x32xf32> to vector<8x32xf32>
    %cst_28 = arith.constant dense<0.000000e+00> : vector<8x32xf32>
    %48 = tpu.matmul %39, %45, %cst_28 {dimension_numbers = #tpu.dot_dimension_numbers<[1], [0], [0], [1], [0, 0, 1, 1], [], []>} : vector<8x8xf32>, vector<8x32xf32>, vector<8x32xf32> -> vector<8x32xf32>
    %49 = arith.addf %47, %48 : vector<8x32xf32>
    %c1_29 = arith.constant 1 : index
    %c0_30 = arith.constant 0 : index
    %c0_31 = arith.constant 0 : index
    %50 = vector.load %arg5[%c1_29, %c0_30, %c0_31] : memref<2x8x32xf32, #tpu.memory_space<vmem>>, vector<1x8x32xf32>
    %51 = vector.shape_cast %50 : vector<1x8x32xf32> to vector<8x32xf32>
    %52 = vector.shape_cast %49 : vector<8x32xf32> to vector<1x8x32xf32>
    tpu.vector_store %arg5[%c1_29, %c0_30, %c0_31], %52 {strides = array<i32>} : memref<2x8x32xf32, #tpu.memory_space<vmem>>, vector<1x8x32xf32>,
    %c0_i32_32 = arith.constant 0 : i32
    %53 = arith.cmpi eq, %arg1, %c0_i32_32 : i32
    %54 = arith.extui %53 : i1 to i32
    %c0_i32_33 = arith.constant 0 : i32
    %55 = arith.cmpi ne, %54, %c0_i32_33 : i32
    scf.if %55 {
      %c0_34 = arith.constant 0 : index
      %c0_35 = arith.constant 0 : index
      %c0_36 = arith.constant 0 : index
      %56 = vector.load %arg5[%c0_34, %c0_35, %c0_36] : memref<2x8x32xf32, #tpu.memory_space<vmem>>, vector<2x8x32xf32>
      %c0_37 = arith.constant 0 : index
      %c0_38 = arith.constant 0 : index
      %c0_39 = arith.constant 0 : index
      %57 = vector.load %arg4[%c0_37, %c0_38, %c0_39] : memref<2x8x32xf32, #tpu.memory_space<vmem>>, vector<2x8x32xf32>
      tpu.vector_store %arg4[%c0_37, %c0_38, %c0_39], %56 {strides = array<i32>} : memref<2x8x32xf32, #tpu.memory_space<vmem>>, vector<2x8x32xf32>,
    } else {
    }
    return
  }
  func.func @transform_0(%arg0: i32, %arg1: i32) -> (i32, i32, i32) {
    %c0_i32 = arith.constant 0 : i32
    %c0_i32_0 = arith.constant 0 : i32
    %c0_i32_1 = arith.constant 0 : i32
    return %arg0, %c0_i32, %c0_i32_0 : i32, i32, i32
  }
  func.func @transform_1(%arg0: i32, %arg1: i32) -> (i32, i32, i32) {
    %c0_i32 = arith.constant 0 : i32
    %c0_i32_0 = arith.constant 0 : i32
    return %arg0, %arg1, %c0_i32 : i32, i32, i32
  }
  func.func @transform_2(%arg0: i32, %arg1: i32) -> (i32, i32, i32) {
    %c0_i32 = arith.constant 0 : i32
    %c0_i32_0 = arith.constant 0 : i32
    %c0_i32_1 = arith.constant 0 : i32
    return %arg0, %c0_i32, %c0_i32_0 : i32, i32, i32
  }
}

</mosaic_0001>

<bundles_post_ra>
// kernel: dot_product_self_attention.1
= control target key start
LH: loop header
LB: loop body
LE: loop exit
PB: predicated region body
PF: predicated region fallthrough
CT: control target
= control target key end

     0   :  { %7 = vsyncpa [#allocation4], 0  ;;  %s678_s0 = inlined_call_operand.hbm [shape: f32[2,8,32], index: 0, kind: input, shape index: {}, may-alias: {0,1}]   ;;  %s679_s1 = inlined_call_operand.hbm [shape: f32[2,8,32], index: 1, kind: input, shape index: {}, may-alias: {0,1}]   ;;  %s680_s2 = inlined_call_operand.hbm [shape: f32[2,8,32], index: 2, kind: output, shape index: {}]  }
   0x1   :  { %8 = vsyncpa [#allocation7], 0 }
   0x2   :  { %9 = vsyncpa [#allocation5], 0  ;;  %s617_s9 = smov [#allocation3]  }
   0x3   :  { %s15_s10 = sshll.u32 %s617_s9, 4  ;;  %s16_s10 = int_to_ptr.vmem [resolvable:$true] %s15_s10 }
   0x4   :  { %s559_s11 = scalar_lea.vmem %s16_s10, 256  ;;  %p564_p1 = scmp.lt.s32.totalorder %s16_s10, %s16_s10 }
   0x5   :  { %p560_p0 = scmp.ne.s32.totalorder %s16_s10, %s559_s11  ;;  %p565_p2 = scmp.lt.s32.totalorder %s559_s11, %s559_s11 }
   0x7   :  { %p566_p3 = por %p565_p2, %p564_p1 }
   0x9   :  { %p567_p4 = pnand %p566_p3, %p560_p0 }
   0xb   :  { %570 = shalt.err (!%p567_p4)
}
   0xc   :  { %s618_s12 = smov 128   ;;  %s619_s13 = smov 8  }
   0xd   :  { %21 = dma.hbm_to_vmem [thread:$0]  %s678_s0, 256, %s16_s10, [#allocation4], %s618_s12, %s618_s12, %s619_s13  }
   0xe   :  { %s620_s16 = smov [#allocation6]  }
   0xf   :  { %s27_s17 = sshll.u32 %s620_s16, 4  ;;  %s28_s17 = int_to_ptr.vmem [resolvable:$true] %s27_s17 }
  0x10   :  { %s579_s18 = scalar_lea.vmem %s28_s17, 256  ;;  %p584_p6 = scmp.lt.s32.totalorder %s28_s17, %s28_s17 }
  0x11   :  { %p580_p5 = scmp.ne.s32.totalorder %s28_s17, %s579_s18  ;;  %p585_p7 = scmp.lt.s32.totalorder %s579_s18, %s579_s18 }
  0x13   :  { %p586_p8 = por %p585_p7, %p584_p6 }
  0x15   :  { %p587_p9 = pnand %p586_p8, %p580_p5 }
  0x17   :  { %590 = shalt.err (!%p587_p9)
}
  0x18   :  { %33 = dma.hbm_to_vmem [thread:$0]  %s679_s1, 256, %s28_s17, [#allocation7], %s618_s12, %s618_s12, %s619_s13  }
  0x19   :  { %611 = dma.done.wait [#allocation4], 256  }
  0x1a   :  { %612 = vsyncadd [#allocation4], 4294967040 }
  0x1b   :  { %613 = dma.done.wait [#allocation7], 256  }
  0x1c   :  { %614 = vsyncadd [#allocation7], 4294967040  ;;  %vm44_vm0 = vcmask 261120   ;;  %v621_v0 = vmov 0.0   ;;  %vm622_vm1 = vmmov 0   ;;  %v49_v1 = vld [vmem:[#allocation6] sm:$0xff] }
  0x1d   :  { %513 = vmatprep.subr.mxu0 %v621_v0  ;;  %45 = vst.msk [vmem:[#allocation2] sm:$0xff] %vm44_vm0, %v621_v0  ;;  %46 = vst.msk [vmem:[#allocation2 + $0x8] sm:$0xff] %vm44_vm0, %v621_v0  ;;  %515 = vmatprep.mubr.msk.f32.mxu0 %vm622_vm1, %v621_v0  ;;  %v47_v2 = vld [vmem:[#allocation3] sm:$0xff]  ;;  %vm127_vm2 = vcmask 64512   ;;  %v623_v24 = vmov 0   ;;  %v261_v28 = vld [vmem:[#allocation3 + $0x8] sm:$0xff] }
  0x1e   :  { %518 = vmatprep.subr.mxu1 %v621_v0  ;;  %520 = vmatprep.mubr.msk.f32.mxu1 %vm622_vm1, %v621_v0  ;;  %v48_v3 = vmul.f32 0.17677669, %v47_v2  ;;  %v264_v29 = vld [vmem:[#allocation6 + $0x8] sm:$0xff]  ;;  %v262_v30 = vmul.f32 0.17677669, %v261_v28  ;;  %s624_s0 = smov [#allocation8]  }
  0x1f   :  { %514 = vmatpush3.xpose.msk.msra.mxu0 %vm44_vm0, %v49_v1  ;;  %s486_s1 = sshll.u32 %s624_s0, 4  ;;  %s487_s1 = int_to_ptr.vmem [resolvable:$true] %s486_s1 }
  0x20   :  { %528 = vmatprep.subr.mxu0 %v621_v0  ;;  %s591_s21 = scalar_lea.vmem %s487_s1, 256  ;;  %p596_p11 = scmp.lt.s32.totalorder %s487_s1, %s487_s1 }
  0x21   :  { %p592_p10 = scmp.ne.s32.totalorder %s487_s1, %s591_s21  ;;  %p597_p12 = scmp.lt.s32.totalorder %s591_s21, %s591_s21 }
  0x22   :  { %516 = vmatmul.mubr.msk.f32.vlgmr.msra.gmra.mxu0 %vm44_vm0, %v48_v3 }
  0x23   :  { %530 = vmatprep.mubr.msk.f32.mxu0 %vm622_vm1, %v621_v0  ;;  %p598_p13 = por %p597_p12, %p596_p11 }
  0x24   :  { %v184_v31 = vld [vmem:[#allocation2] sm:$0xff]  ;;  %v398_v59 = vld [vmem:[#allocation2 + $0x8] sm:$0xff] }
  0x25   :  { %p599_p0 = pnand %p598_p13, %p592_p10 }
  0xe2   :  { %v123_v4 = vpop.f32.mrf.mxu0 }
  0xe3   :  { %v128_v5 = vsel %vm127_vm2, %v123_v4, -inf }
  0xe4   :  { %v129_v6 = vrot.slane %v128_v5, 4  ;;  %v517_v7 = vpop.f32.mrf.mxu0 }
  0xe6   :  { %v130_v8 = vmax.f32 %v128_v5, %v129_v6 }
  0xe8   :  { %v131_v9 = vrot.slane %v130_v8, 2 }
  0xea   :  { %v132_v10 = vmax.f32 %v130_v8, %v131_v9 }
  0xec   :  { %v133_v11 = vrot.slane %v132_v10, 1 }
  0xee   :  { %v134_v12 = vmax.f32 %v132_v10, %v133_v11 }
  0xf0   :  { %v135_v13 = vsub.f32 %v123_v4, %v134_v12 }
  0xf2   :  { %v136_v14 = vmul.f32 1.442695, %v135_v13 }
  0xf4   :  { %543 = vpow2.f32 %v136_v14 }
 0x101   :  { %v544_v15 = vpop.eup %543 }
 0x102   :  { %v138_v16 = vsel %vm127_vm2, %v544_v15, 0.0 }
 0x103   :  { %v139_v17 = vrot.slane %v138_v16, 4 }
 0x105   :  { %v140_v18 = vadd.f32 %v139_v17, %v138_v16 }
 0x107   :  { %v141_v19 = vrot.slane %v140_v18, 2 }
 0x109   :  { %v142_v20 = vadd.f32 %v141_v19, %v140_v18 }
 0x10b   :  { %v143_v21 = vrot.slane %v142_v20, 1 }
 0x10d   :  { %v144_v22 = vadd.f32 %v143_v21, %v142_v20 }
 0x10f   :  { %545 = vrcp.f32 %v144_v22 }
 0x11c   :  { %v546_v23 = vpop.eup %545 }
 0x11d   :  { %146 = vxpose.xlu0.b32.start.end [1/1] (short) (narrow) %v546_v23, 8 }
 0x146   :  { %541 = vset.pattern.permute.xlu0 %v623_v24 }
 0x199   :  { %v162_v25 = vpop.trf.xlu0 }
 0x19a   :  { %180 = vperm.xlu0 %541, %v162_v25  }
 0x215   :  { %v181_v26 = vpop.permute.xlu0 %180 }
 0x216   :  { %v183_v27 = vmul.f32 %v181_v26, %v49_v1 }
 0x218   :  { %519 = vmatpush3.msra.mxu1 %v183_v27 }
 0x219   :  { %521 = vmatmul.mubr.msk.f32.vlgmr.msra.gmra.mxu1 %vm127_vm2, %v544_v15  ;;  %523 = vmatprep.subr.mxu1 %v621_v0 }
 0x21a   :  { %524 = vmatpush3.xpose.msk.msra.mxu1 %vm44_vm0, %v264_v29  ;;  %525 = vmatprep.mubr.msk.f32.mxu1 %vm622_vm1, %v621_v0 }
 0x21d   :  { %526 = vmatmul.mubr.msk.f32.vlgmr.msra.gmra.mxu1 %vm44_vm0, %v262_v30 }
 0x2d9   :  { %v254_v32 = vpop.f32.mrf.mxu1 }
 0x2da   :  { %v258_v33 = vadd.f32 %v254_v32, %v184_v31 }
 0x2db   :  { %v522_v34 = vpop.f32.mrf.mxu1 }
 0x2dc   :  { %259 = vst.msk [vmem:[#allocation2] sm:$0xff] %vm44_vm0, %v258_v33 }
 0x2dd   :  { %v337_v35 = vpop.f32.mrf.mxu1 }
 0x2de   :  { %v341_v36 = vsel %vm127_vm2, %v337_v35, -inf }
 0x2df   :  { %v342_v37 = vrot.slane %v341_v36, 4  ;;  %v527_v38 = vpop.f32.mrf.mxu1 }
 0x2e1   :  { %v343_v39 = vmax.f32 %v341_v36, %v342_v37 }
 0x2e3   :  { %v344_v40 = vrot.slane %v343_v39, 2  ;;  %v477_v41 = vld [vmem:[#allocation2] sm:$0xff] }
 0x2e4   :  { %479 = vst.msk [vmem:[#allocation8] sm:$0xff] %vm44_vm0, %v477_v41 }
 0x2e5   :  { %v345_v42 = vmax.f32 %v343_v39, %v344_v40 }
 0x2e7   :  { %v346_v43 = vrot.slane %v345_v42, 1 }
 0x2e9   :  { %v347_v44 = vmax.f32 %v345_v42, %v346_v43 }
 0x2eb   :  { %v348_v45 = vsub.f32 %v337_v35, %v347_v44 }
 0x2ed   :  { %v349_v46 = vmul.f32 1.442695, %v348_v45 }
 0x2ef   :  { %547 = vpow2.f32 %v349_v46 }
 0x2fc   :  { %v548_v47 = vpop.eup %547 }
 0x2fd   :  { %v351_v48 = vsel %vm127_vm2, %v548_v47, 0.0 }
 0x2fe   :  { %v352_v49 = vrot.slane %v351_v48, 4 }
 0x300   :  { %v353_v50 = vadd.f32 %v352_v49, %v351_v48 }
 0x302   :  { %v354_v51 = vrot.slane %v353_v50, 2 }
 0x304   :  { %v355_v52 = vadd.f32 %v354_v51, %v353_v50 }
 0x306   :  { %v356_v53 = vrot.slane %v355_v52, 1 }
 0x308   :  { %v357_v54 = vadd.f32 %v356_v53, %v355_v52 }
 0x30a   :  { %549 = vrcp.f32 %v357_v54 }
 0x317   :  { %v550_v55 = vpop.eup %549 }
 0x318   :  { %359 = vxpose.xlu1.b32.start.end [1/1] (short) (narrow) %v550_v55, 8 }
 0x336   :  { %542 = vset.pattern.permute.xlu1 %v623_v24 }
 0x394   :  { %v375_v56 = vpop.trf.xlu1 }
 0x395   :  { %393 = vperm.xlu1 %542, %v375_v56  }
 0x410   :  { %v394_v57 = vpop.permute.xlu1 %393 }
 0x411   :  { %v396_v58 = vmul.f32 %v394_v57, %v264_v29 }
 0x413   :  { %529 = vmatpush3.msra.mxu0 %v396_v58 }
 0x414   :  { %531 = vmatmul.mubr.msk.f32.vlgmr.msra.gmra.mxu0 %vm127_vm2, %v548_v47 }
 0x4d4   :  { %v468_v60 = vpop.f32.mrf.mxu0 }
 0x4d5   :  { %v472_v61 = vadd.f32 %v468_v60, %v398_v59 }
 0x4d6   :  { %v532_v62 = vpop.f32.mrf.mxu0 }
 0x4d7   :  { %473 = vst.msk [vmem:[#allocation2 + $0x8] sm:$0xff] %vm44_vm0, %v472_v61 }
 0x4de   :  { %v478_v63 = vld [vmem:[#allocation2 + $0x8] sm:$0xff] }
 0x4df   :  { %480 = vst.msk [vmem:[#allocation8 + $0x8] sm:$0xff] %vm44_vm0, %v478_v63 }
 0x4e0   :  { %602 = shalt.err (!%p599_p0)
}
 0x4e1   :  { %492 = dma.vmem_to_hbm [thread:$0]  %s487_s1, 256, %s680_s2, [#allocation5], %s618_s12, %s618_s12, %s619_s13  }
 0x4e2   :  { %615 = dma.done.wait [#allocation5], 256  }
 0x4e3   :  { %616 = vsyncadd [#allocation5], 4294967040 }
 0x4e4   :  { %496 = vsyncpa [#allocation4], 1 }
 0x4e5   :  { %497 = vsyncpa [#allocation7], 1 }
 0x4e6   :  { %498 = vsyncpa [#allocation5], 1 }

</bundles_post_ra>
